<compile_context>
chip_gen: v7x
topology: tpu7x:2x2x1
jax: 0.10.0
libtpu: 0.0.40
codegen_flags: <defaults>
</compile_context>

<pallas_src>
import jax
import jax.numpy as jnp
from jax.experimental import pallas as pl
from jax.experimental.pallas import tpu as pltpu

_LANES = 128           # vreg lane width (last dim)
_MAX_TILE_ROWS = 4096  # 4096 * 128 * 4 B = 2 MiB per f32 block


def _linear_1x1_kernel(w_ref, b_ref, x_ref, o_ref):
    # w_ref / b_ref: (1, 1) f32 in SMEM (scalar path).
    # x_ref / o_ref: (tm, 128) tiles in VMEM; cast happens in-kernel.
    w = w_ref[0, 0]
    b = b_ref[0, 0]
    o_ref[...] = (x_ref[...].astype(jnp.float32) * w + b).astype(o_ref.dtype)


def _run_lane_dense(x2d, w2, b2, out_dtype):
    """Run the scale+bias kernel over a lane-dense (rows, 128) array."""
    rows = x2d.shape[0]
    # If the whole array fits in one (<= 2 MiB) block, use the full extent
    # (always a legal block shape).  Otherwise use 4096-row blocks (multiple
    # of 8/16/32 sublanes for any dtype); the final block may be ragged and
    # Pallas masks its stores.
    tm = rows if rows <= _MAX_TILE_ROWS else _MAX_TILE_ROWS
    grid = (pl.cdiv(rows, tm),)

    n_elems = rows * _LANES
    bytes_accessed = n_elems * (x2d.dtype.itemsize + jnp.dtype(out_dtype).itemsize)

    return pl.pallas_call(
        _linear_1x1_kernel,
        out_shape=jax.ShapeDtypeStruct((rows, _LANES), out_dtype),
        grid=grid,
        in_specs=[
            pl.BlockSpec(memory_space=pltpu.SMEM),          # w (scalar)
            pl.BlockSpec(memory_space=pltpu.SMEM),          # b (scalar)
            pl.BlockSpec((tm, _LANES), lambda i: (i, 0)),   # x tile
        ],
        out_specs=pl.BlockSpec((tm, _LANES), lambda i: (i, 0)),
        compiler_params=pltpu.CompilerParams(
            dimension_semantics=("parallel",),   # rows are independent
            vmem_limit_bytes=32 << 20,           # 2x(in+out) blocks = 8 MiB << 32 MiB
        ),
        cost_estimate=pl.CostEstimate(
            flops=2 * n_elems,
            transcendentals=0,
            bytes_accessed=bytes_accessed,
        ),
    )(w2, b2, x2d)


def linear_regression_forward(x, w, b):
    """y = x @ W^T + b for in_features = out_features = 1.

    x: (N, 1) float
    w: (1, 1) float   (nn.Linear weight)
    b: (1,)   float   (nn.Linear bias)
    returns (N, 1) in x.dtype
    """
    n = x.shape[0]
    out_dtype = x.dtype

    w2 = jnp.asarray(w, jnp.float32).reshape(1, 1)
    b2 = jnp.asarray(b, jnp.float32).reshape(1, 1)

    # Lane-dense repack: (N, 1) -> (rows, 128).  Zero-copy when N % 128 == 0.
    x_flat = x.reshape(-1)                    # (N, 1) -> (N,): free
    rows = max(pl.cdiv(n, _LANES), 1)
    padded = rows * _LANES
    aligned = padded == n
    if not aligned:
        # Unavoidable only when N % 128 != 0: pad < 128 elements so the
        # lane-dense view exists.  Padded lanes compute 0*w+b and are sliced
        # off below, so results are unaffected.
        x_flat = jnp.pad(x_flat, (0, padded - n))
    x2d = x_flat.reshape(rows, _LANES)

    y2d = _run_lane_dense(x2d, w2, b2, out_dtype)

    y_flat = y2d.reshape(-1)                  # free
    if not aligned:
        y_flat = y_flat[:n]                   # only on the unaligned path
    return y_flat.reshape(n, 1)               # free


if __name__ == "__main__":
    key = jax.random.PRNGKey(0)
    kx, kw, kb = jax.random.split(key, 3)

    # Deterministic parameters matching nn.Linear(1, 1) shapes.
    w = jax.random.uniform(kw, (1, 1), minval=-1.0, maxval=1.0, dtype=jnp.float32)
    b = jax.random.uniform(kb, (1,), minval=-1.0, maxval=1.0, dtype=jnp.float32)

    # 1) Aligned batch (zero-copy fast path): N = 256 -> (2, 128) single block.
    x = jax.random.normal(kx, (256, 1), dtype=jnp.float32)
    y = jax.block_until_ready(linear_regression_forward(x, w, b))
    y_ref = x @ w.T + b
    assert y.shape == (256, 1)
    assert jnp.allclose(y, y_ref, atol=1e-6), "mismatch vs reference (aligned)"

    # 2) Non-multiple-of-128 batch (pad + slice path): N = 1000.
    x_odd = jax.random.normal(kx, (1000, 1), dtype=jnp.float32)
    y_odd = jax.block_until_ready(linear_regression_forward(x_odd, w, b))
    y_odd_ref = x_odd @ w.T + b
    assert y_odd.shape == (1000, 1)
    assert jnp.allclose(y_odd, y_odd_ref, atol=1e-6), "mismatch vs reference (padded)"

    # 3) Multi-block grid with a ragged final block: 5000 rows of 128 lanes.
    x_big = jax.random.normal(kx, (5000 * 128, 1), dtype=jnp.float32)
    y_big = jax.block_until_ready(linear_regression_forward(x_big, w, b))
    y_big_ref = x_big @ w.T + b
    assert y_big.shape == (5000 * 128, 1)
    assert jnp.allclose(y_big, y_big_ref, atol=1e-6), "mismatch vs reference (multi-block)"

    print("KERNEL_OK")
</pallas_src>

<mosaic_0001>
module attributes {stable_mosaic.version = 11 : i64} {
  func.func @_linear_1x1_kernel(%arg0: i32, %arg1: memref<1x1xf32, #tpu.memory_space<smem>>, %arg2: memref<1x1xf32, #tpu.memory_space<smem>>, %arg3: memref<2x128xf32, #tpu.memory_space<vmem>>, %arg4: memref<2x128xf32, #tpu.memory_space<vmem>>) attributes {dimension_semantics = [#tpu.dimension_semantics<parallel>], iteration_bounds = array<i64: 1>, scalar_prefetch = 0 : i64, scratch_operands = 0 : i64, tpu.core_type = #tpu.core_type<tc>, window_params = [{transform_indices = @transform_0, window_bounds = array<i64: 1, 1>}, {transform_indices = @transform_1, window_bounds = array<i64: 1, 1>}, {transform_indices = @transform_2, window_bounds = array<i64: 2, 128>}, {transform_indices = @transform_3, window_bounds = array<i64: 2, 128>}]} {
    %c0 = arith.constant 0 : index
    %c0_0 = arith.constant 0 : index
    %0 = memref.load %arg1[%c0, %c0_0] : memref<1x1xf32, #tpu.memory_space<smem>>
    %c0_1 = arith.constant 0 : index
    %c0_2 = arith.constant 0 : index
    %1 = memref.load %arg2[%c0_1, %c0_2] : memref<1x1xf32, #tpu.memory_space<smem>>
    %c0_3 = arith.constant 0 : index
    %c0_4 = arith.constant 0 : index
    %2 = vector.load %arg3[%c0_3, %c0_4] : memref<2x128xf32, #tpu.memory_space<vmem>>, vector<2x128xf32>
    %3 = vector.broadcast %0 : f32 to vector<2x128xf32>
    %4 = arith.mulf %2, %3 : vector<2x128xf32>
    %5 = vector.broadcast %1 : f32 to vector<2x128xf32>
    %6 = arith.addf %4, %5 : vector<2x128xf32>
    %c0_5 = arith.constant 0 : index
    %c0_6 = arith.constant 0 : index
    %7 = vector.load %arg4[%c0_5, %c0_6] : memref<2x128xf32, #tpu.memory_space<vmem>>, vector<2x128xf32>
    tpu.vector_store %arg4[%c0_5, %c0_6], %6 {strides = array<i32>} : memref<2x128xf32, #tpu.memory_space<vmem>>, vector<2x128xf32>,
    return
  }
  func.func @transform_0(%arg0: i32) -> (i32, i32) {
    %c0_i32 = arith.constant 0 : i32
    %c0_i32_0 = arith.constant 0 : i32
    %c0_i32_1 = arith.constant 0 : i32
    return %c0_i32, %c0_i32_0 : i32, i32
  }
  func.func @transform_1(%arg0: i32) -> (i32, i32) {
    %c0_i32 = arith.constant 0 : i32
    %c0_i32_0 = arith.constant 0 : i32
    %c0_i32_1 = arith.constant 0 : i32
    return %c0_i32, %c0_i32_0 : i32, i32
  }
  func.func @transform_2(%arg0: i32) -> (i32, i32) {
    %c0_i32 = arith.constant 0 : i32
    %c0_i32_0 = arith.constant 0 : i32
    return %arg0, %c0_i32 : i32, i32
  }
  func.func @transform_3(%arg0: i32) -> (i32, i32) {
    %c0_i32 = arith.constant 0 : i32
    %c0_i32_0 = arith.constant 0 : i32
    return %arg0, %c0_i32 : i32, i32
  }
}

</mosaic_0001>

<bundles_post_ra>
// kernel: tpu_custom_call.1
= control target key start
LH: loop header
LB: loop body
LE: loop exit
PB: predicated region body
PF: predicated region fallthrough
CT: control target
= control target key end

     0   :  { %s106_s0 = inlined_call_operand.<no memory space> [shape: f32[1,1], index: 0, kind: input, shape index: {}]   ;;  %s107_s1 = inlined_call_operand.<no memory space> [shape: f32[1,1], index: 1, kind: input, shape index: {}]   ;;  %s108_s2 = inlined_call_operand.vmem [shape: f32[2,128], index: 2, kind: input, shape index: {}]   ;;  %s109_s3 = inlined_call_operand.hbm [shape: f32[2,128], index: 3, kind: output, shape index: {}]  }
   0x1   :  { %v19_v0 = vld [vmem:[%s108_s2] sm:$0x3]  ;;  %v20_v1 = vstv %s106_s0  ;;  %v22_v2 = vstv %s107_s1 }
   0x2   :  { %10 = vsyncpa [#allocation5], 0  ;;  %v21_v3 = vmul.f32 %v20_v1, %v19_v0  ;;  %s64_s18 = smov [#allocation4]  }
   0x3   :  { %s31_s19 = sshll.u32 %s64_s18, 4  ;;  %s32_s19 = int_to_ptr.vmem [resolvable:$true] %s31_s19 }
   0x4   :  { %v23_v4 = vadd.f32 %v22_v2, %v21_v3  ;;  %s40_s20 = scalar_lea.vmem %s32_s19, 32  ;;  %p45_p1 = scmp.lt.s32.totalorder %s32_s19, %s32_s19 }
   0x5   :  { %p41_p0 = scmp.ne.s32.totalorder %s32_s19, %s40_s20  ;;  %p46_p2 = scmp.lt.s32.totalorder %s40_s20, %s40_s20 }
   0x6   :  { %24 = vst [vmem:[#allocation4] sm:$0x3] %v23_v4 }
   0x7   :  { %p47_p3 = por %p46_p2, %p45_p1 }
   0x9   :  { %p48_p4 = pnand %p47_p3, %p41_p0 }
   0xb   :  { %51 = shalt.err (!%p48_p4)
}
   0xc   :  { %s52_s21 = scalar_lea.hbm %s109_s3, 32 }
   0xd   :  { %p53_p5 = scmp.ne.s32.totalorder %s109_s3, %s52_s21  ;;  %p56_p6 = scmp.lt.u32.totalorder %s52_s21, %s109_s3 }
   0xf   :  { %p58_p7 = pnand %p56_p6, %p53_p5 }
  0x11   :  { %61 = shalt.err (!%p58_p7)
}
  0x12   :  { %34 = dma.vmem_to_hbm [thread:$0]  %s32_s19, 32, %s109_s3, [#allocation5]  }
  0x13   :  { %62 = dma.done.wait [#allocation5], 32  }
  0x14   :  { %63 = vsyncadd [#allocation5], 4294967264 }
  0x15   :  { %38 = vsyncpa [#allocation5], 1 }

</bundles_post_ra>
